<compile_context>
chip_gen: v6e
topology: v6e:2x2x1
jax: 0.10.0
libtpu: 0.0.40
codegen_flags: <defaults>
</compile_context>

<pallas_src>
import jax
import jax.numpy as jnp
from jax.experimental import pallas as pl
from jax.experimental.pallas import tpu as pltpu


def mlp_q_kernel(x_ref, w1_ref, b1_ref, w2_ref, b2_ref, w3_ref, b3_ref, out_ref):
    """One batch tile: x is (obs_dim, TILE_B) lane-dense; out is (act_dim, TILE_B)."""
    x = x_ref[...]

    # Layer 1: (hid1, obs_dim) @ (obs_dim, TILE_B) -> (hid1, TILE_B), f32 accumulate.
    w1 = w1_ref[...]
    h1 = jnp.dot(w1, x.astype(w1.dtype), preferred_element_type=jnp.float32)
    h1 = jnp.maximum(h1 + b1_ref[...], 0.0)          # b1 (hid1, 1) broadcasts over lanes

    # Layer 2: (hid2, hid1) @ (hid1, TILE_B) -> (hid2, TILE_B).
    w2 = w2_ref[...]
    h2 = jnp.dot(w2, h1.astype(w2.dtype), preferred_element_type=jnp.float32)
    h2 = jnp.maximum(h2 + b2_ref[...], 0.0)

    # Layer 3 (output head, no activation): (act_dim, hid2) @ (hid2, TILE_B).
    w3 = w3_ref[...]
    q = jnp.dot(w3, h2.astype(w3.dtype), preferred_element_type=jnp.float32)
    out_ref[...] = (q + b3_ref[...]).astype(out_ref.dtype)


def _round_up(x, m):
    return (x + m - 1) // m * m


def mlp_q_forward(obs, params, tile_b=8192):
    """Pallas wrapper. obs: (B, obs_dim). Returns torch.squeeze(q, -1) semantics."""
    w1, b1, w2, b2, w3, b3 = params
    batch, obs_dim = obs.shape
    hid1, hid2, act_dim = w1.shape[0], w2.shape[0], w3.shape[0]

    # Stream obs in the weight dtype (bf16 params => halved obs HBM traffic on
    # v6e/v7x); bias/ReLU math inside the kernel stays f32.
    if obs.dtype != w1.dtype:
        obs = obs.astype(w1.dtype)

    # Lane-dense input layout: (obs_dim, B) so the streamed (obs_dim, TILE_B)
    # block has batch on the 128-wide lane axis and no padding waste.
    # TODO(synk): if the producer can emit obs already as (obs_dim, B), this
    # wrapper transpose (one extra XLA pass over obs) disappears entirely.
    obs_t = obs.T

    # Batch tile: as large as tile_b allows (amortizes ~0.35us/grid-step
    # overhead), but for batches > 128 rows pick a lane-aligned tile that
    # yields >= 2 grid steps so both v7x TensorCores get work under
    # dimension_semantics=("parallel",).
    if batch <= 128:
        tile = batch
    else:
        tile = min(_round_up(pl.cdiv(batch, 2), 128), _round_up(tile_b, 128))
    padded = _round_up(batch, tile)
    if padded != batch:
        obs_t = jnp.pad(obs_t, ((0, 0), (0, padded - batch)))
    grid = (padded // tile,)

    q_t = pl.pallas_call(
        mlp_q_kernel,
        out_shape=jax.ShapeDtypeStruct((act_dim, padded), jnp.float32),
        grid=grid,
        in_specs=[
            pl.BlockSpec((obs_dim, tile), lambda i: (0, i)),   # streamed, lane-dense
            pl.BlockSpec((hid1, obs_dim), lambda i: (0, 0)),   # resident weights/biases
            pl.BlockSpec((hid1, 1), lambda i: (0, 0)),
            pl.BlockSpec((hid2, hid1), lambda i: (0, 0)),
            pl.BlockSpec((hid2, 1), lambda i: (0, 0)),
            pl.BlockSpec((act_dim, hid2), lambda i: (0, 0)),
            pl.BlockSpec((act_dim, 1), lambda i: (0, 0)),
        ],
        out_specs=pl.BlockSpec((act_dim, tile), lambda i: (0, i)),  # lane-dense q^T
        compiler_params=pltpu.CompilerParams(
            dimension_semantics=("parallel",),  # v7x: split batch tiles across both TCs
        ),
    )(obs_t, w1, b1, w2, b2, w3, b3)

    if padded != batch:
        q_t = q_t[:, :batch]
    # torch.squeeze(q, -1): drop the act dimension only if it has size 1.
    if act_dim == 1:
        return q_t[0]
    return q_t.T


def init_params(key, obs_dim, hidden_sizes, act_dim, dtype=jnp.float32):
    """nn.Linear-style U(-1/sqrt(fan_in), 1/sqrt(fan_in)) init, in kernel layout:
    weights (out, in) == PyTorch layout, biases as (out, 1) columns."""
    sizes = [obs_dim] + list(hidden_sizes) + [act_dim]
    params = []
    for j in range(len(sizes) - 1):
        fan_in, fan_out = sizes[j], sizes[j + 1]
        key, kw, kb = jax.random.split(key, 3)
        bound = 1.0 / jnp.sqrt(fan_in)
        w = jax.random.uniform(kw, (fan_out, fan_in), jnp.float32, -bound, bound)
        b = jax.random.uniform(kb, (fan_out, 1), jnp.float32, -bound, bound)
        # Weights may be bf16 (halves obs + weight DMA); biases stay f32.
        params += [w.astype(dtype), b]
    return tuple(params)


def reference_forward(obs, params):
    """Pure-JAX reference with the same activation-dtype casts as the kernel."""
    w1, b1, w2, b2, w3, b3 = params

    def lin(x, w, b):
        y = jnp.dot(x.astype(w.dtype), w.T, preferred_element_type=jnp.float32)
        return y + b[:, 0]

    h = jnp.maximum(lin(obs, w1, b1), 0.0)
    h = jnp.maximum(lin(h, w2, b2), 0.0)
    q = lin(h, w3, b3)
    if q.shape[-1] == 1:
        q = q[..., 0]
    return q


# TODO(synk): for twin-Q (SAC/TD3) training, fuse multiple critics and/or the
# (obs, next_obs) evaluations into one pallas_call via an extra leading grid
# axis over stacked weights, to amortize launch + per-step overhead.

if __name__ == "__main__":
    obs_dim, hidden = 16, (32, 32)

    # Case 1: canonical Q head — act_dim=1, tiny batch (single grid step),
    # exercises the squeeze(-1) path.
    batch1, act1 = 8, 1
    key = jax.random.PRNGKey(0)
    key, k_obs = jax.random.split(key)
    obs1 = jax.random.normal(k_obs, (batch1, obs_dim), jnp.float32)
    params1 = init_params(key, obs_dim, hidden, act1)
    q1 = jax.block_until_ready(mlp_q_forward(obs1, params1))
    q1_ref = reference_forward(obs1, params1)
    assert q1.shape == (batch1,), f"unexpected output shape {q1.shape}"
    assert jnp.allclose(q1, q1_ref, atol=2e-4, rtol=2e-4), "case1 mismatch vs reference"

    # Case 2: multi-tile batch grid (3 tiles + remainder padding) and act_dim > 1.
    batch2, act2 = 300, 3
    key2 = jax.random.PRNGKey(0)
    key2, k_obs2 = jax.random.split(key2)
    obs2 = jax.random.normal(k_obs2, (batch2, obs_dim), jnp.float32)
    params2 = init_params(key2, obs_dim, hidden, act2)
    q2 = jax.block_until_ready(mlp_q_forward(obs2, params2, tile_b=128))
    q2_ref = reference_forward(obs2, params2)
    assert q2.shape == (batch2, act2), f"unexpected output shape {q2.shape}"
    assert jnp.allclose(q2, q2_ref, atol=2e-4, rtol=2e-4), "case2 mismatch vs reference"

    # Case 3: bf16 params (obs streamed as bf16, halved DMA); activations are
    # quantized to bf16 before each matmul so tolerance is looser.
    batch3, act3 = 64, 1
    key3 = jax.random.PRNGKey(0)
    key3, k_obs3 = jax.random.split(key3)
    obs3 = jax.random.normal(k_obs3, (batch3, obs_dim), jnp.float32)
    params3 = init_params(key3, obs_dim, hidden, act3, dtype=jnp.bfloat16)
    q3 = jax.block_until_ready(mlp_q_forward(obs3, params3))
    q3_ref = reference_forward(obs3, params3)
    assert q3.shape == (batch3,), f"unexpected output shape {q3.shape}"
    assert jnp.allclose(q3, q3_ref, atol=2e-2, rtol=2e-2), "case3 mismatch vs reference"

    print("KERNEL_OK")
</pallas_src>

<mosaic_0001>
module attributes {stable_mosaic.version = 11 : i64} {
  func.func @mlp_q_kernel(%arg0: i32, %arg1: memref<16x8xf32, #tpu.memory_space<vmem>>, %arg2: memref<32x16xf32, #tpu.memory_space<vmem>>, %arg3: memref<32x1xf32, #tpu.memory_space<vmem>>, %arg4: memref<32x32xf32, #tpu.memory_space<vmem>>, %arg5: memref<32x1xf32, #tpu.memory_space<vmem>>, %arg6: memref<1x32xf32, #tpu.memory_space<vmem>>, %arg7: memref<1x1xf32, #tpu.memory_space<vmem>>, %arg8: memref<1x8xf32, #tpu.memory_space<vmem>>) attributes {dimension_semantics = [#tpu.dimension_semantics<parallel>], iteration_bounds = array<i64: 1>, scalar_prefetch = 0 : i64, scratch_operands = 0 : i64, tpu.core_type = #tpu.core_type<tc>, window_params = [{transform_indices = @transform_0, window_bounds = array<i64: 16, 8>}, {pipeline_mode = #tpu.pipeline_mode<synchronous>, transform_indices = @transform_1, window_bounds = array<i64: 32, 16>}, {pipeline_mode = #tpu.pipeline_mode<synchronous>, transform_indices = @transform_2, window_bounds = array<i64: 32, 1>}, {pipeline_mode = #tpu.pipeline_mode<synchronous>, transform_indices = @transform_3, window_bounds = array<i64: 32, 32>}, {pipeline_mode = #tpu.pipeline_mode<synchronous>, transform_indices = @transform_4, window_bounds = array<i64: 32, 1>}, {pipeline_mode = #tpu.pipeline_mode<synchronous>, transform_indices = @transform_5, window_bounds = array<i64: 1, 32>}, {pipeline_mode = #tpu.pipeline_mode<synchronous>, transform_indices = @transform_6, window_bounds = array<i64: 1, 1>}, {transform_indices = @transform_7, window_bounds = array<i64: 1, 8>}]} {
    %c0 = arith.constant 0 : index
    %c0_0 = arith.constant 0 : index
    %0 = vector.load %arg1[%c0, %c0_0] : memref<16x8xf32, #tpu.memory_space<vmem>>, vector<16x8xf32>
    %c0_1 = arith.constant 0 : index
    %c0_2 = arith.constant 0 : index
    %1 = vector.load %arg2[%c0_1, %c0_2] : memref<32x16xf32, #tpu.memory_space<vmem>>, vector<32x16xf32>
    %cst = arith.constant dense<0.000000e+00> : vector<32x8xf32>
    %2 = tpu.matmul %1, %0, %cst {dimension_numbers = #tpu.dot_dimension_numbers<[1], [0], [0], [1], [0, 0, 1, 1], [], []>} : vector<32x16xf32>, vector<16x8xf32>, vector<32x8xf32> -> vector<32x8xf32>
    %c0_3 = arith.constant 0 : index
    %c0_4 = arith.constant 0 : index
    %3 = vector.load %arg3[%c0_3, %c0_4] : memref<32x1xf32, #tpu.memory_space<vmem>>, vector<32x1xf32>
    %4 = vector.broadcast %3 : vector<32x1xf32> to vector<32x8xf32>
    %5 = arith.addf %2, %4 : vector<32x8xf32>
    %cst_5 = arith.constant 0.000000e+00 : f32
    %6 = vector.broadcast %cst_5 : f32 to vector<32x8xf32>
    %7 = arith.maximumf %5, %6 : vector<32x8xf32>
    %c0_6 = arith.constant 0 : index
    %c0_7 = arith.constant 0 : index
    %8 = vector.load %arg4[%c0_6, %c0_7] : memref<32x32xf32, #tpu.memory_space<vmem>>, vector<32x32xf32>
    %cst_8 = arith.constant dense<0.000000e+00> : vector<32x8xf32>
    %9 = tpu.matmul %8, %7, %cst_8 {dimension_numbers = #tpu.dot_dimension_numbers<[1], [0], [0], [1], [0, 0, 1, 1], [], []>} : vector<32x32xf32>, vector<32x8xf32>, vector<32x8xf32> -> vector<32x8xf32>
    %c0_9 = arith.constant 0 : index
    %c0_10 = arith.constant 0 : index
    %10 = vector.load %arg5[%c0_9, %c0_10] : memref<32x1xf32, #tpu.memory_space<vmem>>, vector<32x1xf32>
    %11 = vector.broadcast %10 : vector<32x1xf32> to vector<32x8xf32>
    %12 = arith.addf %9, %11 : vector<32x8xf32>
    %cst_11 = arith.constant 0.000000e+00 : f32
    %13 = vector.broadcast %cst_11 : f32 to vector<32x8xf32>
    %14 = arith.maximumf %12, %13 : vector<32x8xf32>
    %c0_12 = arith.constant 0 : index
    %c0_13 = arith.constant 0 : index
    %15 = vector.load %arg6[%c0_12, %c0_13] : memref<1x32xf32, #tpu.memory_space<vmem>>, vector<1x32xf32>
    %cst_14 = arith.constant dense<0.000000e+00> : vector<1x8xf32>
    %16 = tpu.matmul %15, %14, %cst_14 {dimension_numbers = #tpu.dot_dimension_numbers<[1], [0], [0], [1], [0, 0, 1, 1], [], []>} : vector<1x32xf32>, vector<32x8xf32>, vector<1x8xf32> -> vector<1x8xf32>
    %c0_15 = arith.constant 0 : index
    %c0_16 = arith.constant 0 : index
    %17 = vector.load %arg7[%c0_15, %c0_16] : memref<1x1xf32, #tpu.memory_space<vmem>>, vector<1x1xf32>
    %18 = vector.broadcast %17 : vector<1x1xf32> to vector<1x8xf32>
    %19 = arith.addf %16, %18 : vector<1x8xf32>
    %c0_17 = arith.constant 0 : index
    %c0_18 = arith.constant 0 : index
    %20 = vector.load %arg8[%c0_17, %c0_18] : memref<1x8xf32, #tpu.memory_space<vmem>>, vector<1x8xf32>
    tpu.vector_store %arg8[%c0_17, %c0_18], %19 {strides = array<i32>} : memref<1x8xf32, #tpu.memory_space<vmem>>, vector<1x8xf32>,
    return
  }
  func.func @transform_0(%arg0: i32) -> (i32, i32) {
    %c0_i32 = arith.constant 0 : i32
    %c0_i32_0 = arith.constant 0 : i32
    return %c0_i32, %arg0 : i32, i32
  }
  func.func @transform_1(%arg0: i32) -> (i32, i32) {
    %c0_i32 = arith.constant 0 : i32
    %c0_i32_0 = arith.constant 0 : i32
    %c0_i32_1 = arith.constant 0 : i32
    return %c0_i32, %c0_i32_0 : i32, i32
  }
  func.func @transform_2(%arg0: i32) -> (i32, i32) {
    %c0_i32 = arith.constant 0 : i32
    %c0_i32_0 = arith.constant 0 : i32
    %c0_i32_1 = arith.constant 0 : i32
    return %c0_i32, %c0_i32_0 : i32, i32
  }
  func.func @transform_3(%arg0: i32) -> (i32, i32) {
    %c0_i32 = arith.constant 0 : i32
    %c0_i32_0 = arith.constant 0 : i32
    %c0_i32_1 = arith.constant 0 : i32
    return %c0_i32, %c0_i32_0 : i32, i32
  }
  func.func @transform_4(%arg0: i32) -> (i32, i32) {
    %c0_i32 = arith.constant 0 : i32
    %c0_i32_0 = arith.constant 0 : i32
    %c0_i32_1 = arith.constant 0 : i32
    return %c0_i32, %c0_i32_0 : i32, i32
  }
  func.func @transform_5(%arg0: i32) -> (i32, i32) {
    %c0_i32 = arith.constant 0 : i32
    %c0_i32_0 = arith.constant 0 : i32
    %c0_i32_1 = arith.constant 0 : i32
    return %c0_i32, %c0_i32_0 : i32, i32
  }
  func.func @transform_6(%arg0: i32) -> (i32, i32) {
    %c0_i32 = arith.constant 0 : i32
    %c0_i32_0 = arith.constant 0 : i32
    %c0_i32_1 = arith.constant 0 : i32
    return %c0_i32, %c0_i32_0 : i32, i32
  }
  func.func @transform_7(%arg0: i32) -> (i32, i32) {
    %c0_i32 = arith.constant 0 : i32
    %c0_i32_0 = arith.constant 0 : i32
    return %c0_i32, %arg0 : i32, i32
  }
}

</mosaic_0001>

<bundles_post_ra>
// kernel: tpu_custom_call.1
= control target key start
LH: loop header
LB: loop body
LE: loop exit
PB: predicated region body
PF: predicated region fallthrough
CT: control target
= control target key end

     0   :  { %s598_s0 = inlined_call_operand.vmem [shape: f32[16,8], index: 0, kind: input, shape index: {}]   ;;  %s599_s1 = inlined_call_operand.vmem [shape: f32[32,16], index: 1, kind: input, shape index: {}]   ;;  %s600_s2 = inlined_call_operand.vmem [shape: f32[32,1], index: 2, kind: input, shape index: {}]   ;;  %s601_s3 = inlined_call_operand.vmem [shape: f32[32,32], index: 3, kind: input, shape index: {}]   ;;  %s602_s4 = inlined_call_operand.vmem [shape: f32[32,1], index: 4, kind: input, shape index: {}]   ;;  %s603_s5 = inlined_call_operand.vmem [shape: f32[1,32], index: 5, kind: input, shape index: {}]   ;;  %s604_s6 = inlined_call_operand.<no memory space> [shape: f32[1,1], index: 6, kind: input, shape index: {}]   ;;  %s605_s7 = inlined_call_operand.hbm [shape: f32[1,8], index: 7, kind: output, shape index: {}]  }
   0x1   :  { %v12_v0 = vstv %s604_s6 }
   0x2   :  { %13 = vst [vmem:[#allocation2] sm:$0x1] %v12_v0 }
   0x3   :  { %v30_v1 = vld [vmem:[%s598_s0 + $0x8] sm:$0xff]  ;;  %v29_v2 = vld [vmem:[%s598_s0] sm:$0xff]  ;;  %vm59_vm0 = vcmask 130048   ;;  %v482_v5 = vmov 0   ;;  %v38_v6 = vld [vmem:[%s600_s2 + $0x18] sm:$0xff] }
   0x4   :  { %v31_v3 = vld [vmem:[%s599_s1] sm:$0xff]  ;;  %419 = vmatprep.subr.mxu0 %v30_v1  ;;  %v32_v4 = vld [vmem:[%s599_s1 + $0x8] sm:$0xff]  ;;  %458 = vset.pattern.permute.xlu0 %v482_v5  ;;  %v33_v7 = vld [vmem:[%s599_s1 + $0x10] sm:$0xff] }
   0x5   :  { %423 = vmatprep.mubr.msk.f32.mxu0 %vm59_vm0, %v31_v3  ;;  %420 = vmatpush3.msra.mxu0 %v30_v1  ;;  %v36_v8 = vld [vmem:[%s600_s2 + $0x8] sm:$0xff]  ;;  %v37_v9 = vld [vmem:[%s600_s2 + $0x10] sm:$0xff] }
   0x6   :  { %421 = vmatprep.subr.mxu0 %v29_v2  ;;  %56 = vperm.xlu0 %458, %v38_v6  }
   0x7   :  { %422 = vmatpush3.msra.mxu0 %v29_v2  ;;  %459 = vset.pattern.permute.xlu1 %v482_v5 }
   0x8   :  { %424 = vmatmul.mubr.msk.f32.vlgmr.msra.gmra.mxu0 %vm59_vm0, %v32_v4  ;;  %46 = vperm.xlu1 %459, %v36_v8  }
   0x9   :  { %14 = vsyncpa [#allocation4], 0  ;;  %426 = vmatprep.mubr.msk.f32.mxu0 %vm59_vm0, %v33_v7  ;;  %v34_v10 = vld [vmem:[%s599_s1 + $0x18] sm:$0xff]  ;;  %v35_v11 = vld [vmem:[%s600_s2] sm:$0xff]  ;;  %vm189_vm1 = vcmask 261120   ;;  %v483_v37 = vmov 0.0   ;;  %v298_v55 = vlaneseq }
   0xa   :  { %51 = vperm.xlu0 %458, %v37_v9   ;;  %v168_v12 = vld [vmem:[%s602_s4 + $0x18] sm:$0xff]  ;;  %v167_v13 = vld [vmem:[%s602_s4 + $0x10] sm:$0xff]  ;;  %v166_v14 = vld [vmem:[%s602_s4 + $0x8] sm:$0xff]  ;;  %443 = vmatprep.subr.mxu0 %v483_v37  ;;  %vm484_vm2 = vmmov 0   ;;  %s485_s11 = smov [#allocation3]   ;;  %vm375_vm3 = vcmask 57344  }
   0xb   :  { %v165_v15 = vld [vmem:[%s602_s4] sm:$0xff]  ;;  %v162_v34 = vld [vmem:[%s601_s3 + $0x8] sm:$0xff]  ;;  %v163_v35 = vld [vmem:[%s601_s3 + $0x10] sm:$0xff]  ;;  %v299_v56 = vshrl.u32 %v298_v55, 7  ;;  %s383_s0 = sshll.u32 %s485_s11, 4  ;;  %s384_s0 = int_to_ptr.vmem [resolvable:$true] %s383_s0 }
   0xc   :  { %427 = vmatmul.mubr.msk.f32.gmra.mxu0 %vm59_vm0, %v34_v10  ;;  %41 = vperm.xlu1 %459, %v35_v11   ;;  %v292_v16 = vld [vmem:[#allocation2] sm:$0x1]  ;;  %v164_v36 = vld [vmem:[%s601_s3 + $0x18] sm:$0xff]  ;;  %s460_s12 = scalar_lea.vmem %s384_s0, 16  ;;  %p465_p1 = scmp.lt.s32.totalorder %s384_s0, %s384_s0 }
   0xd   :  { %v161_v17 = vld [vmem:[%s601_s3] sm:$0xff]  ;;  %451 = vmatprep.mubr.msk.f32.mxu0 %vm484_vm2, %v483_v37  ;;  %v300_v57 = vsub.s32 0, %v299_v56  ;;  %p461_p0 = scmp.ne.s32.totalorder %s384_s0, %s460_s12 }
   0xe   :  { %186 = vperm.xlu0 %458, %v168_v12   ;;  %437 = vmatprep.mubr.msk.f32.mxu1 %vm189_vm1, %v161_v17  ;;  %v291_v54 = vld [vmem:[%s603_s5] sm:$0x1]  ;;  %s464_s5 = scalar_lea.vmem %s384_s0, 32 }
   0xf   :  { %p466_p2 = scmp.lt.s32.totalorder %s464_s5, %s460_s12 }
  0x10   :  { %181 = vperm.xlu1 %459, %v167_v13  }
  0x11   :  { %p467_p3 = por %p466_p2, %p465_p1 }
  0x12   :  { %176 = vperm.xlu0 %458, %v166_v14  }
  0x13   :  { %p468_p4 = pnand %p467_p3, %p461_p0 }
  0x14   :  { %171 = vperm.xlu1 %459, %v165_v15  }
  0x16   :  { %295 = vperm.xlu0 %458, %v292_v16  }
  0x81   :  { %v57_v18 = vpop.permute.xlu0 %56 }
  0x83   :  { %v47_v20 = vpop.permute.xlu1 %46 }
  0x85   :  { %v52_v24 = vpop.permute.xlu0 %51 }
  0x87   :  { %v42_v29 = vpop.permute.xlu1 %41 }
  0x89   :  { %v187_v38 = vpop.permute.xlu0 %186 }
  0x8b   :  { %v182_v40 = vpop.permute.xlu1 %181 }
  0x8d   :  { %v177_v44 = vpop.permute.xlu0 %176 }
  0x8f   :  { %v172_v49 = vpop.permute.xlu1 %171 }
  0x91   :  { %v296_v58 = vpop.permute.xlu0 %295 }
  0x92   :  { %v301_v59 = vrot.slane %v296_v58, %v300_v57 }
  0xc8   :  { %v425_v19 = vpop.f32.mrf.mxu0 }
  0xc9   :  { %v144_v26 = vadd.f32 %v425_v19, %v47_v20 }
  0xca   :  { %v138_v21 = vpop.f32.mrf.mxu0 }
  0xcb   :  { %v139_v30 = vadd.f32 %v138_v21, %v42_v29  ;;  %v158_v32 = vmax.f32 %v144_v26, 0.0 }
  0xcc   :  { %v428_v22 = vpop.f32.mrf.mxu0 }
  0xcd   :  { %v154_v23 = vadd.f32 %v428_v22, %v57_v18  ;;  %v157_v33 = vmax.f32 %v139_v30, 0.0 }
  0xce   :  { %v148_v25 = vpop.f32.mrf.mxu0 }
  0xcf   :  { %v160_v27 = vmax.f32 %v154_v23, 0.0  ;;  %v149_v28 = vadd.f32 %v148_v25, %v52_v24 }
  0xd1   :  { %v159_v31 = vmax.f32 %v149_v28, 0.0  ;;  %429 = vmatprep.subr.mxu1 %v160_v27 }
  0xd2   :  { %430 = vmatpush3.msra.mxu1 %v160_v27 }
  0xd3   :  { %431 = vmatprep.subr.mxu1 %v159_v31 }
  0xd4   :  { %432 = vmatpush3.msra.mxu1 %v159_v31 }
  0xd5   :  { %433 = vmatprep.subr.mxu1 %v158_v32 }
  0xd6   :  { %434 = vmatpush3.msra.mxu1 %v158_v32 }
  0xd7   :  { %435 = vmatprep.subr.mxu1 %v157_v33 }
  0xd8   :  { %436 = vmatpush3.msra.mxu1 %v157_v33 }
  0xd9   :  { %438 = vmatmul.mubr.msk.f32.vlgmr.msra.gmra.mxu1 %vm189_vm1, %v162_v34 }
  0xda   :  { %440 = vmatprep.mubr.msk.f32.mxu1 %vm189_vm1, %v163_v35 }
  0xdd   :  { %441 = vmatmul.mubr.msk.f32.gmra.mxu1 %vm189_vm1, %v164_v36 }
 0x199   :  { %v439_v39 = vpop.f32.mrf.mxu1 }
 0x19a   :  { %v274_v46 = vadd.f32 %v439_v39, %v177_v44 }
 0x19b   :  { %v268_v41 = vpop.f32.mrf.mxu1 }
 0x19c   :  { %v269_v50 = vadd.f32 %v268_v41, %v172_v49  ;;  %v288_v52 = vmax.f32 %v274_v46, 0.0 }
 0x19d   :  { %v442_v42 = vpop.f32.mrf.mxu1 }
 0x19e   :  { %v284_v43 = vadd.f32 %v442_v42, %v187_v38  ;;  %v287_v53 = vmax.f32 %v269_v50, 0.0 }
 0x19f   :  { %v278_v45 = vpop.f32.mrf.mxu1 }
 0x1a0   :  { %v290_v47 = vmax.f32 %v284_v43, 0.0  ;;  %v279_v48 = vadd.f32 %v278_v45, %v182_v40 }
 0x1a2   :  { %v289_v51 = vmax.f32 %v279_v48, 0.0  ;;  %444 = vmatpush3.msra.mxu0 %v290_v47 }
 0x1a3   :  { %445 = vmatprep.subr.mxu0 %v483_v37 }
 0x1a4   :  { %446 = vmatpush3.msra.mxu0 %v289_v51 }
 0x1a5   :  { %447 = vmatprep.subr.mxu0 %v483_v37 }
 0x1a6   :  { %448 = vmatpush3.msra.mxu0 %v288_v52 }
 0x1a7   :  { %449 = vmatprep.subr.mxu0 %v483_v37 }
 0x1a8   :  { %450 = vmatpush3.msra.mxu0 %v287_v53 }
 0x1a9   :  { %452 = vmatmul.mubr.msk.f32.vlgmr.msra.gmra.mxu0 %vm189_vm1, %v291_v54 }
 0x269   :  { %v371_v60 = vpop.f32.mrf.mxu0 }
 0x26a   :  { %v372_v61 = vadd.f32 %v371_v60, %v301_v59 }
 0x26b   :  { %v453_v62 = vpop.f32.mrf.mxu0 }
 0x26c   :  { %376 = vst.msk [vmem:[#allocation3] sm:$0x1] %vm375_vm3, %v372_v61 }
 0x26d   :  { %471 = shalt.err (!%p468_p4)
}
 0x26e   :  { %386 = dma.vmem_to_hbm [thread:$0]  %s384_s0, 16, %s605_s7, [#allocation4]  }
 0x26f   :  { %480 = dma.done.wait [#allocation4], 16  }
 0x270   :  { %481 = vsyncadd [#allocation4], 4294967280 }
 0x271   :  { %390 = vsyncpa [#allocation4], 1 }

</bundles_post_ra>
